<compile_context>
chip_gen: v7x
topology: tpu7x:2x2x1
jax: 0.10.0
libtpu: 0.0.40
codegen_flags: <defaults>
</compile_context>

<pallas_src>
import functools

import jax
import jax.numpy as jnp
from jax.experimental import pallas as pl
from jax.experimental.pallas import tpu as pltpu

_LANES = 128  # vreg lane width (last dim)


def _sublanes_for(dtype) -> int:
    # Packing-tile second-to-last dim: f32 -> 8, bf16/f16 -> 16, int8/fp8 -> 32.
    itemsize = jnp.dtype(dtype).itemsize
    return max(8, 32 // max(1, itemsize))


def _round_up(a: int, b: int) -> int:
    return ((a + b - 1) // b) * b


def _swish_kernel(x_ref, o_ref):
    x = x_ref[...]
    xf = x.astype(jnp.float32)
    # Exact sigmoid: exp lands on the EUP slot; the mul is VPU work hidden under
    # the HBM stream. (pl.reciprocal(approx=True) would be faster on v7x but
    # breaks the 1e-6 f32 tolerance, so we keep the exact form.)
    o_ref[...] = (xf * jax.nn.sigmoid(xf)).astype(o_ref.dtype)


@functools.partial(jax.jit, static_argnames=("row_tile", "min_grid_steps"))
def swish(x: jax.Array, *, row_tile: int = 8192, min_grid_steps: int = 8) -> jax.Array:
    """Elementwise Swish/SiLU via a Pallas TPU kernel. Works for any shape/float dtype."""
    orig_shape = x.shape
    orig_dtype = x.dtype
    n = x.size
    if n == 0:  # empty-tensor guard
        return x

    sublanes = _sublanes_for(orig_dtype)

    x_flat = jnp.ravel(x)

    # Pad only up to a lane multiple (128). For typical NCHW activations this is
    # a zero-copy path (n % 128 == 0); partial sublane blocks are handled by the
    # cdiv grid, so no extra padding to a full (sublanes, 128) tile is needed.
    n_pad = (-n) % _LANES
    if n_pad:
        # TODO(synk): handle the ragged tail fully in-kernel (scalar-prefetched
        # valid count + masked store) to avoid this extra HBM pass for shapes
        # whose flat size is not a multiple of 128.
        x_flat = jnp.pad(x_flat, (0, n_pad))

    rows = x_flat.size // _LANES
    x2d = x_flat.reshape(rows, _LANES)

    # Block sizing: as large as row_tile allows, but keep at least
    # min_grid_steps grid steps so double-buffering overlaps DMA with compute
    # and the v7x two-TensorCore split has work to shard.
    if rows < sublanes:
        block_rows = rows  # full-extent block for tiny inputs
    else:
        block_rows = min(row_tile, _round_up(pl.cdiv(rows, min_grid_steps), sublanes))
        block_rows = max(sublanes, (block_rows // sublanes) * sublanes)
    grid = (pl.cdiv(rows, block_rows),)

    out2d = pl.pallas_call(
        _swish_kernel,
        out_shape=jax.ShapeDtypeStruct((rows, _LANES), orig_dtype),
        grid_spec=pltpu.PrefetchScalarGridSpec(
            num_scalar_prefetch=0,
            grid=grid,
            in_specs=[pl.BlockSpec((block_rows, _LANES), lambda i: (i, 0))],
            out_specs=pl.BlockSpec((block_rows, _LANES), lambda i: (i, 0)),
        ),
        compiler_params=pltpu.CompilerParams(
            dimension_semantics=("parallel",),  # megacore sharding on v7x
            # Double-buffered in+out at 4 MiB f32 blocks needs ~16 MiB; raise the
            # scoped-VMEM limit past v5e's 16 MiB default while staying well
            # under v7x's 64 MiB physical VMEM.
            vmem_limit_bytes=48 * 1024 * 1024,
        ),
    )(x2d)

    out_flat = out2d.reshape(-1)
    if n_pad:
        out_flat = out_flat[:n]
    return out_flat.reshape(orig_shape)


if __name__ == "__main__":
    key = jax.random.PRNGKey(0)

    # Small NCHW input consistent with Swish usage inside a UNet/VAE.
    x = jax.random.normal(key, (2, 4, 16, 16), dtype=jnp.float32)
    y = swish(x)
    jax.block_until_ready(y)
    y_ref = x * jax.nn.sigmoid(x)
    assert y.shape == x.shape and y.dtype == x.dtype
    assert jnp.max(jnp.abs(y - y_ref)) < 1e-6

    # Non-aligned (padded / partial-sublane-block) path.
    x2 = jax.random.normal(jax.random.PRNGKey(1), (3, 5, 7, 11), dtype=jnp.float32)
    y2 = swish(x2)
    jax.block_until_ready(y2)
    y2_ref = x2 * jax.nn.sigmoid(x2)
    assert y2.shape == x2.shape and y2.dtype == x2.dtype
    assert jnp.max(jnp.abs(y2 - y2_ref)) < 1e-6

    # bf16 path (dtype-aware sublane tiling; f32 compute inside the kernel).
    x3 = jax.random.normal(jax.random.PRNGKey(2), (2, 4, 16, 16), dtype=jnp.bfloat16)
    y3 = swish(x3)
    jax.block_until_ready(y3)
    y3_ref = (x3.astype(jnp.float32) * jax.nn.sigmoid(x3.astype(jnp.float32))).astype(jnp.bfloat16)
    assert y3.shape == x3.shape and y3.dtype == x3.dtype
    assert jnp.max(jnp.abs(y3.astype(jnp.float32) - y3_ref.astype(jnp.float32))) < 2e-2

    print("KERNEL_OK")
</pallas_src>

<mosaic_0001>
module attributes {stable_mosaic.version = 11 : i64} {
  func.func @_swish_kernel(%arg0: i32, %arg1: memref<8x128xf32, #tpu.memory_space<vmem>>, %arg2: memref<8x128xf32, #tpu.memory_space<vmem>>) attributes {dimension_semantics = [#tpu.dimension_semantics<parallel>], iteration_bounds = array<i64: 2>, scalar_prefetch = 0 : i64, scratch_operands = 0 : i64, tpu.core_type = #tpu.core_type<tc>, window_params = [{transform_indices = @transform_0, window_bounds = array<i64: 8, 128>}, {transform_indices = @transform_1, window_bounds = array<i64: 8, 128>}]} {
    %c0 = arith.constant 0 : index
    %c0_0 = arith.constant 0 : index
    %0 = vector.load %arg1[%c0, %c0_0] : memref<8x128xf32, #tpu.memory_space<vmem>>, vector<8x128xf32>
    %1 = arith.negf %0 : vector<8x128xf32>
    %2 = math.exp %1 : vector<8x128xf32>
    %cst = arith.constant 1.000000e+00 : f32
    %3 = vector.broadcast %cst : f32 to vector<8x128xf32>
    %4 = arith.addf %3, %2 : vector<8x128xf32>
    %5 = arith.divf %3, %4 : vector<8x128xf32>
    %6 = arith.mulf %0, %5 : vector<8x128xf32>
    %c0_1 = arith.constant 0 : index
    %c0_2 = arith.constant 0 : index
    %7 = vector.load %arg2[%c0_1, %c0_2] : memref<8x128xf32, #tpu.memory_space<vmem>>, vector<8x128xf32>
    tpu.vector_store %arg2[%c0_1, %c0_2], %6 {strides = array<i32>} : memref<8x128xf32, #tpu.memory_space<vmem>>, vector<8x128xf32>,
    return
  }
  func.func @transform_0(%arg0: i32) -> (i32, i32) {
    %c0_i32 = arith.constant 0 : i32
    %c0_i32_0 = arith.constant 0 : i32
    return %arg0, %c0_i32 : i32, i32
  }
  func.func @transform_1(%arg0: i32) -> (i32, i32) {
    %c0_i32 = arith.constant 0 : i32
    %c0_i32_0 = arith.constant 0 : i32
    return %arg0, %c0_i32 : i32, i32
  }
}

</mosaic_0001>

<bundles_post_ra>
// kernel: swish.1
= control target key start
LH: loop header
LB: loop body
LE: loop exit
PB: predicated region body
PF: predicated region fallthrough
CT: control target
= control target key end

     0   :  { %s200_s6 = smov 0   ;;  %s220_s0 = inlined_call_operand.vmem [shape: f32[16,128], index: 0, kind: input, shape index: {}]   ;;  %s221_s1 = inlined_call_operand.vmem [shape: f32[16,128], index: 1, kind: output, shape index: {}]  }
   0x1 LB: > { %s174_s7 = sadd.s32 4294967295, %s202_s6   ;;  %p178_p0 = scmp.ge.s32.totalorder %s202_s6, 1  ;;  %s202_s6 = sphi %s200_s6, %s11_s6  }
   0x2   : > { %p86_p1 = scmp.lt.s32.totalorder %s202_s6, 3 }
   0x4   : > { %p87_p2 = pnand %p178_p0, %p86_p1 }
   0x5   : > { %p104_p3 = scmp.lt.s32.totalorder (!%p87_p2), %s174_s7, 1 }
   0x6   : > { %90 = sbr.rel (%p87_p2) target bundleno = 46 (0x2e), region = 24 }
   0xd   : > { %s223_s7 = smov (!%p104_p3, %s174_s7), 1 }
   0xe   : > { %s179_s8 = sshll.u32 %s223_s7, 3 }
   0xf   : > { %s107_s11 = scalar_lea.vmem %s220_s0, %s179_s8  ;;  %s111_s14 = scalar_lea.vmem %s221_s1, %s179_s8 }
  0x10   : > { %v112_v0 = vld [vmem:[%s107_s11] sm:$0xff] }
  0x11   : > { %v181_v1 = vmul.f32 -1.442695, %v112_v0 }
  0x13   : > { %192 = vpow2.f32 %v181_v1 }
  0x1d   : > { %v193_v2 = vpop.eup %192 }
  0x1e   : > { %v116_v3 = vadd.f32 1.0, %v193_v2 }
  0x20   : > { %194 = vrcp.f32 %v116_v3 }
  0x2a   : > { %v195_v4 = vpop.eup %194 }
  0x2b   : > { %v119_v5 = vmul.f32 %v195_v4, %v112_v0 }
  0x2d   : > { %120 = vst [vmem:[%s111_s14] sm:$0xff] %v119_v5 }
  0x2e PF: > { %s11_s6 = sadd.s32 1, %s202_s6  }
  0x2f   : > { %p8_p4 = scmp.ge.s32.totalorder %s11_s6, 4  }
  0x31   :  { %10 = sbr.rel (!%p8_p4) target bundleno = 1 (0x1), region = 54 }

</bundles_post_ra>
